<compile_context>
chip_gen: v7x
topology: tpu7x:2x2x1
jax: 0.10.0
libtpu: 0.0.40
codegen_flags: <defaults>
</compile_context>

<pallas_src>
import jax
import jax.numpy as jnp
from jax.experimental import pallas as pl
from jax.experimental.pallas import tpu as pltpu


def _round_up(n, m):
    return ((n + m - 1) // m) * m


def mlp1_sig_kernel(x_ref, w1_ref, b1_ref, w2_ref, b2_ref, o_ref):
    # fc1 (bf16 MXU matmul, f32 accumulation) + bias
    h = jnp.dot(x_ref[...], w1_ref[...], preferred_element_type=jnp.float32)
    h = h + b1_ref[...]                       # (TB, 128) + (1, 128), full-vreg VPU add
    # numerically stable logsigmoid: min(h, 0) - log(1 + exp(-|h|))   (exp/log on EUP)
    h = jnp.minimum(h, 0.0) - jnp.log(1.0 + jnp.exp(-jnp.abs(h)))
    # fc2
    out = jnp.dot(h.astype(w2_ref.dtype), w2_ref[...],
                  preferred_element_type=jnp.float32)
    out = out + b2_ref[...]                   # (TB, 128) + (1, 128)
    o_ref[...] = out.astype(o_ref.dtype)      # lane-dense (128-wide) store


def mlp1_sig_forward(x, w1, b1, w2, b2, *, tb_max=1024):
    """x: (B, 784) f32; w1: (784, 64); b1: (64,); w2: (64, 10); b2: (10,).
    Weights stored (in, out) so the kernel computes x @ W + b (== PyTorch x @ W.T + b)."""
    B, K = x.shape
    H = w1.shape[1]
    N = w2.shape[1]
    Hp = _round_up(H, 128)                    # 64  -> 128
    Np = _round_up(N, 128)                    # 10  -> 128

    TB = min(tb_max, _round_up(B, 8))         # batch tile (>=8 sublanes, <=1024)
    B_pad = _round_up(B, TB)

    # bf16 inputs/weights for the MXU; zero-pads keep results exact.
    xb = x.astype(jnp.bfloat16)
    if B_pad != B:
        xb = jnp.pad(xb, ((0, B_pad - B), (0, 0)))
    w1p = jnp.pad(w1, ((0, 0), (0, Hp - H))).astype(jnp.bfloat16)
    b1p = jnp.pad(b1.reshape(1, H), ((0, 0), (0, Hp - H))).astype(jnp.float32)
    w2p = jnp.pad(w2, ((0, Hp - H), (0, Np - N))).astype(jnp.bfloat16)
    b2p = jnp.pad(b2.reshape(1, N), ((0, 0), (0, Np - N))).astype(jnp.float32)

    grid = (B_pad // TB,)
    out = pl.pallas_call(
        mlp1_sig_kernel,
        out_shape=jax.ShapeDtypeStruct((B_pad, Np), jnp.float32),
        grid=grid,
        in_specs=[
            pl.BlockSpec((TB, K), lambda i: (i, 0)),     # x tile marches over batch
            pl.BlockSpec((K, Hp), lambda i: (0, 0)),     # w1 resident
            pl.BlockSpec((1, Hp), lambda i: (0, 0)),     # b1 resident
            pl.BlockSpec((Hp, Np), lambda i: (0, 0)),    # w2 resident
            pl.BlockSpec((1, Np), lambda i: (0, 0)),     # b2 resident
        ],
        out_specs=pl.BlockSpec((TB, Np), lambda i: (i, 0)),
        compiler_params=pltpu.CompilerParams(
            dimension_semantics=("parallel",)),          # batch axis -> both TCs on v7x
    )(xb, w1p, b1p, w2p, b2p)
    return out[:B, :N]


def init_params(key):
    """Deterministic init mimicking nn.Linear default (U(-1/sqrt(fan_in), +))."""
    k1, k2, k3, k4 = jax.random.split(key, 4)
    fan1 = 28 * 28
    fan2 = 64
    bound1 = 1.0 / jnp.sqrt(fan1)
    bound2 = 1.0 / jnp.sqrt(fan2)
    # stored as (in, out) so the kernel does x @ W
    w1 = jax.random.uniform(k1, (fan1, 64), jnp.float32, -bound1, bound1)
    b1 = jax.random.uniform(k2, (64,), jnp.float32, -bound1, bound1)
    w2 = jax.random.uniform(k3, (fan2, 10), jnp.float32, -bound2, bound2)
    b2 = jax.random.uniform(k4, (10,), jnp.float32, -bound2, bound2)
    return w1, b1, w2, b2


if __name__ == "__main__":
    key = jax.random.PRNGKey(0)
    kx, kp = jax.random.split(key)
    B = 2
    x = jax.random.normal(kx, (B, 28 * 28), jnp.float32)
    w1, b1, w2, b2 = init_params(kp)

    out = mlp1_sig_forward(x, w1, b1, w2, b2)
    out = jax.block_until_ready(out)

    # plain-JAX f32 reference (same math as the PyTorch forward)
    ref = jax.nn.log_sigmoid(x @ w1 + b1[None, :]) @ w2 + b2[None, :]
    assert out.shape == (B, 10)
    # bf16 inputs/weights (f32 accumulation) => loosen tolerance vs f32 reference
    assert jnp.allclose(out, ref, atol=5e-2, rtol=5e-2), (out, ref)

    print("KERNEL_OK")
</pallas_src>

<mosaic_0001>
module attributes {stable_mosaic.version = 11 : i64} {
  func.func @mlp1_sig_kernel(%arg0: i32, %arg1: memref<8x784xbf16, #tpu.memory_space<vmem>>, %arg2: memref<784x128xbf16, #tpu.memory_space<vmem>>, %arg3: memref<1x128xf32, #tpu.memory_space<vmem>>, %arg4: memref<128x128xbf16, #tpu.memory_space<vmem>>, %arg5: memref<1x128xf32, #tpu.memory_space<vmem>>, %arg6: memref<8x128xf32, #tpu.memory_space<vmem>>) attributes {dimension_semantics = [#tpu.dimension_semantics<parallel>], iteration_bounds = array<i64: 1>, scalar_prefetch = 0 : i64, scratch_operands = 0 : i64, tpu.core_type = #tpu.core_type<tc>, window_params = [{transform_indices = @transform_0, window_bounds = array<i64: 8, 784>}, {pipeline_mode = #tpu.pipeline_mode<synchronous>, transform_indices = @transform_1, window_bounds = array<i64: 784, 128>}, {pipeline_mode = #tpu.pipeline_mode<synchronous>, transform_indices = @transform_2, window_bounds = array<i64: 1, 128>}, {pipeline_mode = #tpu.pipeline_mode<synchronous>, transform_indices = @transform_3, window_bounds = array<i64: 128, 128>}, {pipeline_mode = #tpu.pipeline_mode<synchronous>, transform_indices = @transform_4, window_bounds = array<i64: 1, 128>}, {transform_indices = @transform_5, window_bounds = array<i64: 8, 128>}]} {
    %c0 = arith.constant 0 : index
    %c0_0 = arith.constant 0 : index
    %0 = vector.load %arg1[%c0, %c0_0] : memref<8x784xbf16, #tpu.memory_space<vmem>>, vector<8x784xbf16>
    %c0_1 = arith.constant 0 : index
    %c0_2 = arith.constant 0 : index
    %1 = vector.load %arg2[%c0_1, %c0_2] : memref<784x128xbf16, #tpu.memory_space<vmem>>, vector<784x128xbf16>
    %cst = arith.constant dense<0.000000e+00> : vector<8x128xf32>
    %2 = tpu.matmul %0, %1, %cst {dimension_numbers = #tpu.dot_dimension_numbers<[1], [0], [0], [1], [0, 0, 1, 1], [], []>} : vector<8x784xbf16>, vector<784x128xbf16>, vector<8x128xf32> -> vector<8x128xf32>
    %c0_3 = arith.constant 0 : index
    %c0_4 = arith.constant 0 : index
    %3 = vector.load %arg3[%c0_3, %c0_4] : memref<1x128xf32, #tpu.memory_space<vmem>>, vector<1x128xf32>
    %4 = vector.broadcast %3 : vector<1x128xf32> to vector<8x128xf32>
    %5 = arith.addf %2, %4 : vector<8x128xf32>
    %cst_5 = arith.constant 0.000000e+00 : f32
    %6 = vector.broadcast %cst_5 : f32 to vector<8x128xf32>
    %7 = arith.minimumf %5, %6 : vector<8x128xf32>
    %8 = math.absf %5 : vector<8x128xf32>
    %cst_6 = arith.constant 0.000000e+00 : f32
    %9 = vector.broadcast %cst_6 : f32 to vector<8x128xf32>
    %10 = arith.subf %9, %8 : vector<8x128xf32>
    %11 = math.exp %10 : vector<8x128xf32>
    %cst_7 = arith.constant 1.000000e+00 : f32
    %12 = vector.broadcast %cst_7 : f32 to vector<8x128xf32>
    %13 = arith.addf %12, %11 : vector<8x128xf32>
    %14 = math.log %13 : vector<8x128xf32>
    %15 = arith.subf %7, %14 : vector<8x128xf32>
    %16 = arith.truncf %15 : vector<8x128xf32> to vector<8x128xbf16>
    %c0_8 = arith.constant 0 : index
    %c0_9 = arith.constant 0 : index
    %17 = vector.load %arg4[%c0_8, %c0_9] : memref<128x128xbf16, #tpu.memory_space<vmem>>, vector<128x128xbf16>
    %cst_10 = arith.constant dense<0.000000e+00> : vector<8x128xf32>
    %18 = tpu.matmul %16, %17, %cst_10 {dimension_numbers = #tpu.dot_dimension_numbers<[1], [0], [0], [1], [0, 0, 1, 1], [], []>} : vector<8x128xbf16>, vector<128x128xbf16>, vector<8x128xf32> -> vector<8x128xf32>
    %c0_11 = arith.constant 0 : index
    %c0_12 = arith.constant 0 : index
    %19 = vector.load %arg5[%c0_11, %c0_12] : memref<1x128xf32, #tpu.memory_space<vmem>>, vector<1x128xf32>
    %20 = vector.broadcast %19 : vector<1x128xf32> to vector<8x128xf32>
    %21 = arith.addf %18, %20 : vector<8x128xf32>
    %c0_13 = arith.constant 0 : index
    %c0_14 = arith.constant 0 : index
    %22 = vector.load %arg6[%c0_13, %c0_14] : memref<8x128xf32, #tpu.memory_space<vmem>>, vector<8x128xf32>
    tpu.vector_store %arg6[%c0_13, %c0_14], %21 {strides = array<i32>} : memref<8x128xf32, #tpu.memory_space<vmem>>, vector<8x128xf32>,
    return
  }
  func.func @transform_0(%arg0: i32) -> (i32, i32) {
    %c0_i32 = arith.constant 0 : i32
    %c0_i32_0 = arith.constant 0 : i32
    return %arg0, %c0_i32 : i32, i32
  }
  func.func @transform_1(%arg0: i32) -> (i32, i32) {
    %c0_i32 = arith.constant 0 : i32
    %c0_i32_0 = arith.constant 0 : i32
    %c0_i32_1 = arith.constant 0 : i32
    return %c0_i32, %c0_i32_0 : i32, i32
  }
  func.func @transform_2(%arg0: i32) -> (i32, i32) {
    %c0_i32 = arith.constant 0 : i32
    %c0_i32_0 = arith.constant 0 : i32
    %c0_i32_1 = arith.constant 0 : i32
    return %c0_i32, %c0_i32_0 : i32, i32
  }
  func.func @transform_3(%arg0: i32) -> (i32, i32) {
    %c0_i32 = arith.constant 0 : i32
    %c0_i32_0 = arith.constant 0 : i32
    %c0_i32_1 = arith.constant 0 : i32
    return %c0_i32, %c0_i32_0 : i32, i32
  }
  func.func @transform_4(%arg0: i32) -> (i32, i32) {
    %c0_i32 = arith.constant 0 : i32
    %c0_i32_0 = arith.constant 0 : i32
    %c0_i32_1 = arith.constant 0 : i32
    return %c0_i32, %c0_i32_0 : i32, i32
  }
  func.func @transform_5(%arg0: i32) -> (i32, i32) {
    %c0_i32 = arith.constant 0 : i32
    %c0_i32_0 = arith.constant 0 : i32
    return %arg0, %c0_i32 : i32, i32
  }
}

</mosaic_0001>

<bundles_post_ra>
// kernel: tpu_custom_call.1
= control target key start
LH: loop header
LB: loop body
LE: loop exit
PB: predicated region body
PF: predicated region fallthrough
CT: control target
= control target key end

     0   :  { %10 = vsyncpa [#allocation3], 0  ;;  %s1230_s0 = inlined_call_operand.hbm [shape: bf16[8,784], index: 0, kind: input, shape index: {}]   ;;  %s1231_s1 = inlined_call_operand.hbm [shape: bf16[784,128], index: 1, kind: input, shape index: {}]   ;;  %s1232_s2 = inlined_call_operand.vmem [shape: f32[1,128], index: 2, kind: input, shape index: {}]   ;;  %s1233_s3 = inlined_call_operand.hbm [shape: bf16[128,128], index: 3, kind: input, shape index: {}]   ;;  %s1234_s4 = inlined_call_operand.vmem [shape: f32[1,128], index: 4, kind: input, shape index: {}]   ;;  %s1235_s5 = inlined_call_operand.hbm [shape: f32[8,128], index: 5, kind: output, shape index: {}]  }
   0x1   :  { %11 = vsyncpa [#allocation6], 0 }
   0x2   :  { %12 = vsyncpa [#allocation4], 0  ;;  %s1130_s18 = smov [#allocation5]   ;;  %s1036_s22 = scalar_lea.hbm %s1231_s1, 6272 }
   0x3   :  { %s28_s19 = sshll.u32 %s1130_s18, 4  ;;  %p1037_p0 = scmp.ne.s32.totalorder %s1231_s1, %s1036_s22  ;;  %s29_s19 = int_to_ptr.vmem [resolvable:$true] %s28_s19 }
   0x4   :  { %p1040_p1 = scmp.lt.u32.totalorder %s1036_s22, %s1231_s1 }
   0x6   :  { %p1042_p2 = pnand %p1040_p1, %p1037_p0 }
   0x8   :  { %1045 = shalt.err (!%p1042_p2)
}
   0x9   :  { %s1046_s27 = scalar_lea.vmem %s29_s19, 6272  ;;  %p1051_p4 = scmp.lt.s32.totalorder %s29_s19, %s29_s19 }
   0xa   :  { %p1047_p3 = scmp.ne.s32.totalorder %s29_s19, %s1046_s27  ;;  %p1052_p5 = scmp.lt.s32.totalorder %s1046_s27, %s1046_s27 }
   0xc   :  { %p1053_p6 = por %p1052_p5, %p1051_p4 }
   0xe   :  { %p1054_p7 = pnand %p1053_p6, %p1047_p3 }
  0x10   :  { %1057 = shalt.err (!%p1054_p7)
}
  0x11   :  { %s1131_s28 = smov 64   ;;  %s1132_s29 = smov 4  }
  0x12   :  { %34 = dma.hbm_to_vmem [thread:$0]  %s1231_s1, 6272, %s29_s19, [#allocation6], %s1131_s28, %s1131_s28, %s1132_s29  }
  0x13   :  { %s1133_s7 = smov [#allocation2]   ;;  %s1134_s9 = smov [#allocation7]  }
  0x14   :  { %s19_s8 = sshll.u32 %s1133_s7, 4  ;;  %s42_s10 = sshll.u32 %s1134_s9, 4  ;;  %s20_s8 = int_to_ptr.vmem [resolvable:$true] %s19_s8  ;;  %s43_s10 = int_to_ptr.vmem [resolvable:$true] %s42_s10 }
  0x15   :  { %s1058_s13 = scalar_lea.hbm %s1230_s0, 448 }
  0x16   :  { %p1059_p8 = scmp.ne.s32.totalorder %s1230_s0, %s1058_s13  ;;  %p1062_p9 = scmp.lt.u32.totalorder %s1058_s13, %s1230_s0 }
  0x18   :  { %p1064_p10 = pnand %p1062_p9, %p1059_p8 }
  0x1a   :  { %1067 = shalt.err (!%p1064_p10)
}
  0x1b   :  { %s1068_s1 = scalar_lea.vmem %s20_s8, 448  ;;  %p1073_p12 = scmp.lt.s32.totalorder %s20_s8, %s20_s8 }
  0x1c   :  { %p1069_p11 = scmp.ne.s32.totalorder %s20_s8, %s1068_s1  ;;  %p1074_p13 = scmp.lt.s32.totalorder %s1068_s1, %s1068_s1 }
  0x1e   :  { %p1075_p0 = por %p1074_p13, %p1073_p12 }
  0x20   :  { %p1076_p1 = pnand %p1075_p0, %p1069_p11 }
  0x22   :  { %1079 = shalt.err (!%p1076_p1)
}
  0x23   :  { %22 = dma.hbm_to_vmem [thread:$0]  %s1230_s0, 448, %s20_s8, [#allocation3]  }
  0x24   :  { %s1080_s22 = scalar_lea.hbm %s1233_s3, 1024 }
  0x25   :  { %p1081_p2 = scmp.ne.s32.totalorder %s1233_s3, %s1080_s22  ;;  %p1084_p3 = scmp.lt.u32.totalorder %s1080_s22, %s1233_s3 }
  0x27   :  { %p1086_p4 = pnand %p1084_p3, %p1081_p2 }
  0x29   :  { %1089 = shalt.err (!%p1086_p4)
}
  0x2a   :  { %s1090_s27 = scalar_lea.vmem %s43_s10, 1024  ;;  %p1095_p6 = scmp.lt.s32.totalorder %s43_s10, %s43_s10 }
  0x2b   :  { %p1091_p5 = scmp.ne.s32.totalorder %s43_s10, %s1090_s27  ;;  %p1096_p7 = scmp.lt.s32.totalorder %s1090_s27, %s1090_s27 }
  0x2d   :  { %p1097_p8 = por %p1096_p7, %p1095_p6 }
  0x2f   :  { %p1098_p9 = pnand %p1097_p8, %p1091_p5 }
  0x31   :  { %1101 = shalt.err (!%p1098_p9)
}
  0x32   :  { %48 = dma.hbm_to_vmem [thread:$0]  %s1233_s3, 1024, %s43_s10, [#allocation6], %s1131_s28, %s1131_s28, %s1132_s29  }
  0x33   :  { %1124 = dma.done.wait [#allocation3], 448  }
  0x34   :  { %1125 = vsyncadd [#allocation3], 4294966848 }
  0x35   :  { %1126 = dma.done.wait [#allocation6], 7296  }
  0x36   :  { %1127 = vsyncadd [#allocation6], 4294960000  ;;  %v968_v0 = vld [vmem:[#allocation5 + $0x40] sm:$0xff]   ;;  %v972_v4 = vld [vmem:[#allocation5 + $0x48] sm:$0xff]   ;;  %v1135_v43 = vmov 0.0   ;;  %vm1136_vm0 = vmmov 0  }
  0x37   :  { %v969_v1 = vld [vmem:[#allocation5] sm:$0xff]   ;;  %857 = vmatprep.subr.bf16.mxu0 %v968_v0  ;;  %v973_v5 = vld [vmem:[#allocation5 + $0x8] sm:$0xff]   ;;  %v976_v8 = vld [vmem:[#allocation5 + $0x50] sm:$0xff]   ;;  %vm488_vm1 = vcmask 130048   ;;  %s1137_s6 = smov [#allocation8]  }
  0x38   :  { %v970_v2 = vld [vmem:[#allocation5 + $0xc0] sm:$0xff]   ;;  %858 = vmatpush3.bf16.msra.mxu0 %v969_v1  ;;  %v974_v6 = vld [vmem:[#allocation5 + $0xc8] sm:$0xff]   ;;  %v977_v9 = vld [vmem:[#allocation5 + $0x10] sm:$0xff]   ;;  %s780_s7 = sshll.u32 %s1137_s6, 4  ;;  %s781_s7 = int_to_ptr.vmem [resolvable:$true] %s780_s7 }
  0x39   :  { %v971_v3 = vld [vmem:[#allocation5 + $0x80] sm:$0xff]   ;;  %879 = vmatprep.subr.bf16.mxu1 %v970_v2  ;;  %859 = vmatprep.subr.bf16.mxu0 %v972_v4  ;;  %v975_v7 = vld [vmem:[#allocation5 + $0x88] sm:$0xff]   ;;  %v978_v10 = vld [vmem:[#allocation5 + $0xd0] sm:$0xff]   ;;  %s1102_s8 = scalar_lea.vmem %s781_s7, 128  ;;  %p1107_p11 = scmp.lt.s32.totalorder %s781_s7, %s781_s7 }
  0x3a   :  { %880 = vmatpush3.bf16.msra.mxu1 %v971_v3  ;;  %v979_v11 = vld [vmem:[#allocation5 + $0x90] sm:$0xff]   ;;  %v980_v12 = vld [vmem:[#allocation5 + $0x58] sm:$0xff]   ;;  %v984_v16 = vld [vmem:[#allocation5 + $0x60] sm:$0xff]   ;;  %p1103_p10 = scmp.ne.s32.totalorder %s781_s7, %s1102_s8  ;;  %p1108_p12 = scmp.lt.s32.totalorder %s1102_s8, %s1102_s8 }
  0x3b   :  { %881 = vmatprep.subr.bf16.mxu1 %v974_v6  ;;  %v981_v13 = vld [vmem:[#allocation5 + $0x18] sm:$0xff]   ;;  %v985_v17 = vld [vmem:[#allocation5 + $0x20] sm:$0xff]   ;;  %v988_v20 = vld [vmem:[#allocation5 + $0x68] sm:$0xff]  }
  0x3c   :  { %860 = vmatpush3.bf16.msra.mxu0 %v973_v5  ;;  %v982_v14 = vld [vmem:[#allocation5 + $0xd8] sm:$0xff]   ;;  %v986_v18 = vld [vmem:[#allocation5 + $0xe0] sm:$0xff]   ;;  %v989_v21 = vld [vmem:[#allocation5 + $0x28] sm:$0xff]   ;;  %p1109_p13 = por %p1108_p12, %p1107_p11 }
  0x3d   :  { %861 = vmatprep.subr.bf16.mxu0 %v976_v8  ;;  %v983_v15 = vld [vmem:[#allocation5 + $0x98] sm:$0xff]   ;;  %v987_v19 = vld [vmem:[#allocation5 + $0xa0] sm:$0xff]   ;;  %v990_v22 = vld [vmem:[#allocation5 + $0xe8] sm:$0xff]  }
  0x3e   :  { %882 = vmatpush3.bf16.msra.mxu1 %v975_v7  ;;  %v991_v23 = vld [vmem:[#allocation5 + $0xa8] sm:$0xff]   ;;  %v992_v24 = vld [vmem:[#allocation5 + $0x70] sm:$0xff]   ;;  %v996_v28 = vld [vmem:[#allocation5 + $0x78] sm:$0xff]   ;;  %p1110_p0 = pnand %p1109_p13, %p1103_p10 }
  0x3f   :  { %883 = vmatprep.subr.bf16.mxu1 %v978_v10  ;;  %v993_v25 = vld [vmem:[#allocation5 + $0x30] sm:$0xff]   ;;  %v997_v29 = vld [vmem:[#allocation5 + $0x38] sm:$0xff]   ;;  %v61_v31 = vld [vmem:[#allocation2] sm:$0xff] }
  0x40   :  { %862 = vmatpush3.bf16.msra.mxu0 %v977_v9  ;;  %v994_v26 = vld [vmem:[#allocation5 + $0xf0] sm:$0xff]   ;;  %v998_v30 = vld [vmem:[#allocation5 + $0xf8] sm:$0xff]   ;;  %v791_v32 = vcombine.low %v61_v31, %v61_v31  ;;  %v792_v33 = vcombine.high %v61_v31, %v61_v31  ;;  %v1002_v35 = vld [vmem:[#allocation5 + $0x140] sm:$0xff]  }
  0x41   :  { %863 = vmatprep.subr.bf16.mxu0 %v980_v12  ;;  %v995_v27 = vld [vmem:[#allocation5 + $0xb0] sm:$0xff]   ;;  %v1001_v34 = vld [vmem:[#allocation5 + $0xb8] sm:$0xff]   ;;  %v1005_v39 = vld [vmem:[#allocation5 + $0x100] sm:$0xff]  }
  0x42   :  { %884 = vmatpush3.bf16.msra.mxu1 %v979_v11  ;;  %v62_v36 = vld [vmem:[#allocation2 + $0x8] sm:$0xff]  ;;  %524 = vmatprep.mubr.bf16.mxu0 %v792_v33  ;;  %v1010_v45 = vld [vmem:[#allocation5 + $0x158] sm:$0xff]   ;;  %v1012_v47 = vld [vmem:[#allocation5 + $0x160] sm:$0xff]  }
  0x43   :  { %885 = vmatprep.subr.bf16.mxu1 %v982_v14  ;;  %v793_v37 = vcombine.low %v62_v36, %v62_v36  ;;  %v794_v38 = vcombine.high %v62_v36, %v62_v36  ;;  %v1006_v40 = vld [vmem:[#allocation5 + $0x148] sm:$0xff]   ;;  %v1008_v42 = vld [vmem:[#allocation5 + $0x150] sm:$0xff]   ;;  %v1011_v46 = vld [vmem:[#allocation5 + $0x118] sm:$0xff]  }
  0x44   :  { %864 = vmatpush3.bf16.msra.mxu0 %v981_v13  ;;  %v1007_v41 = vld [vmem:[#allocation5 + $0x108] sm:$0xff]   ;;  %v1009_v44 = vld [vmem:[#allocation5 + $0x110] sm:$0xff]   ;;  %v1013_v48 = vld [vmem:[#allocation5 + $0x120] sm:$0xff]  }
  0x45   :  { %865 = vmatprep.subr.bf16.mxu0 %v984_v16  ;;  %564 = vmatprep.mubr.bf16.mxu1 %v794_v38  ;;  %v1014_v49 = vld [vmem:[#allocation5 + $0x168] sm:$0xff]   ;;  %v1020_v50 = vld [vmem:[#allocation5 + $0x180] sm:$0xff]   ;;  %v63_v51 = vld [vmem:[#allocation2 + $0x10] sm:$0xff] }
  0x46   :  { %886 = vmatpush3.bf16.msra.mxu1 %v983_v15  ;;  %v1015_v52 = vld [vmem:[#allocation5 + $0x128] sm:$0xff]   ;;  %v796_v53 = vcombine.high %v63_v51, %v63_v51  ;;  %v1023_v54 = vld [vmem:[#allocation2 + $0x18] ss:$0 sps:$4 sm:$0xff]   ;;  %v1016_v55 = vld [vmem:[#allocation5 + $0x170] sm:$0xff]   ;;  %v795_v59 = vcombine.low %v63_v51, %v63_v51 }
  0x47   :  { %887 = vmatprep.subr.bf16.mxu1 %v986_v18  ;;  %v1017_v56 = vld [vmem:[#allocation5 + $0x130] sm:$0xff]   ;;  %v1018_v57 = vld [vmem:[#allocation5 + $0x178] sm:$0xff]   ;;  %v1024_v60 = vld [vmem:[#allocation7] sm:$0xff]  }
  0x48   :  { %866 = vmatpush3.bf16.msra.mxu0 %v985_v17  ;;  %v1019_v58 = vld [vmem:[#allocation5 + $0x138] sm:$0xff]   ;;  %v1025_v61 = vld [vmem:[#allocation7 + $0x8] sm:$0xff]   ;;  %v1027_v63 = vld [vmem:[#allocation7 + $0x18] sm:$0xff]  }
  0x49   :  { %867 = vmatprep.subr.bf16.mxu0 %v988_v20  ;;  %v1026_v62 = vld [vmem:[#allocation7 + $0x10] sm:$0xff]   ;;  %v1028_v0 = vld [vmem:[#allocation7 + $0x20] sm:$0xff]   ;;  %v1029_v1 = vld [vmem:[#allocation7 + $0x28] sm:$0xff]  }
  0x4a   :  { %888 = vmatpush3.bf16.msra.mxu1 %v987_v19  ;;  %v1030_v2 = vld [vmem:[#allocation7 + $0x30] sm:$0xff]   ;;  %v1031_v3 = vld [vmem:[#allocation7 + $0x38] sm:$0xff]  }
  0x4b   :  { %889 = vmatprep.subr.bf16.mxu1 %v990_v22  ;;  %v790_v5 = vld [vmem:[%s1232_s2] ss:$0 sm:$0xff] }
  0x4c   :  { %868 = vmatpush3.bf16.msra.mxu0 %v989_v21  ;;  %v848_v38 = vld [vmem:[%s1234_s4] ss:$0 sm:$0xff] }
  0x4d   :  { %869 = vmatprep.subr.bf16.mxu0 %v992_v24 }
  0x4e   :  { %890 = vmatpush3.bf16.msra.mxu1 %v991_v23 }
  0x4f   :  { %891 = vmatprep.subr.bf16.mxu1 %v994_v26 }
  0x50   :  { %870 = vmatpush3.bf16.msra.mxu0 %v993_v25 }
  0x51   :  { %871 = vmatprep.subr.bf16.mxu0 %v996_v28 }
  0x52   :  { %892 = vmatpush3.bf16.msra.mxu1 %v995_v27 }
  0x53   :  { %893 = vmatprep.subr.bf16.mxu1 %v998_v30 }
  0x54   :  { %872 = vmatpush3.bf16.msra.mxu0 %v997_v29 }
  0x55   :  { %901 = vmatprep.subr.bf16.mxu0 %v1002_v35 }
  0x56   :  { %894 = vmatpush3.bf16.msra.mxu1 %v1001_v34 }
  0x57   :  { %525 = vmatmul.mubr.bf16.vlgmr.msra.gmra.mrb[0].mxu0 %v791_v32  ;;  %934 = vmatprep.subr.bf16.mxu1 %v1135_v43 }
  0x58   :  { %902 = vmatpush3.bf16.msra.mxu0 %v1005_v39  ;;  %604 = vmatprep.mubr.bf16.mxu0 %v796_v53 }
  0x59   :  { %565 = vmatmul.mubr.bf16.vlgmr.msra.gmra.mrb[0].mxu1 %v793_v37  ;;  %903 = vmatprep.subr.bf16.mxu0 %v1006_v40 }
  0x5a   :  { %936 = vmatprep.mubr.msk.bf16.mxu1 %vm1136_vm0, %v1135_v43  ;;  %935 = vmatpush3.bf16.msra.mxu1 %v1020_v50 }
  0x5b   :  { %940 = vmatprep.subr.bf16.mxu1 %v1135_v43 }
  0x5c   :  { %904 = vmatpush3.bf16.msra.mxu0 %v1007_v41 }
  0x5d   :  { %905 = vmatprep.subr.bf16.mxu0 %v1008_v42 }
  0x60   :  { %906 = vmatpush3.bf16.msra.mxu0 %v1009_v44 }
  0x61   :  { %907 = vmatprep.subr.bf16.mxu0 %v1010_v45  ;;  %937 = vmatmul.mubr.msk.bf16.vlgmr.msra.gmra.mrb[4].mxu1 %vm488_vm1, %v1023_v54 }
  0x62   :  { %956 = vmatprep.mubr.msk.bf16.mxu1 %vm1136_vm0, %v1135_v43  ;;  %941 = vmatpush3.bf16.msra.mxu1 %v1024_v60 }
  0x63   :  { %942 = vmatprep.subr.bf16.mxu1 %v1135_v43 }
  0x64   :  { %908 = vmatpush3.bf16.msra.mxu0 %v1011_v46 }
  0x65   :  { %909 = vmatprep.subr.bf16.mxu0 %v1012_v47 }
  0x66   :  { %943 = vmatpush3.bf16.msra.mxu1 %v1025_v61 }
  0x67   :  { %944 = vmatprep.subr.bf16.mxu1 %v1135_v43 }
  0x68   :  { %910 = vmatpush3.bf16.msra.mxu0 %v1013_v48 }
  0x69   :  { %911 = vmatprep.subr.bf16.mxu0 %v1014_v49 }
  0x6a   :  { %945 = vmatpush3.bf16.msra.mxu1 %v1026_v62 }
  0x6b   :  { %946 = vmatprep.subr.bf16.mxu1 %v1135_v43 }
  0x6c   :  { %912 = vmatpush3.bf16.msra.mxu0 %v1015_v52 }
  0x6d   :  { %913 = vmatprep.subr.bf16.mxu0 %v1016_v55 }
  0x6e   :  { %947 = vmatpush3.bf16.msra.mxu1 %v1027_v63 }
  0x6f   :  { %948 = vmatprep.subr.bf16.mxu1 %v1135_v43 }
  0x70   :  { %914 = vmatpush3.bf16.msra.mxu0 %v1017_v56 }
  0x71   :  { %915 = vmatprep.subr.bf16.mxu0 %v1018_v57 }
  0x72   :  { %949 = vmatpush3.bf16.msra.mxu1 %v1028_v0 }
  0x73   :  { %950 = vmatprep.subr.bf16.mxu1 %v1135_v43 }
  0x74   :  { %916 = vmatpush3.bf16.msra.mxu0 %v1019_v58 }
  0x76   :  { %951 = vmatpush3.bf16.msra.mxu1 %v1029_v1 }
  0x77   :  { %605 = vmatmul.mubr.bf16.vlgmr.msra.gmra.mrb[4].mxu0 %v795_v59  ;;  %952 = vmatprep.subr.bf16.mxu1 %v1135_v43 }
  0x7a   :  { %953 = vmatpush3.bf16.msra.mxu1 %v1030_v2 }
  0x7b   :  { %954 = vmatprep.subr.bf16.mxu1 %v1135_v43 }
  0x7e   :  { %955 = vmatpush3.bf16.msra.mxu1 %v1031_v3 }
 0x12a   :  { %v873_v4 = vpop.f32.mrb[0].mxu0 }
 0x12b   :  { %v874_v6 = vpop.f32.mrb[1].mxu0 }
 0x12c   :  { %v875_v7 = vadd.f32 %v874_v6, %v873_v4  ;;  %v876_v8 = vpop.f32.mrb[2].mxu0  ;;  %v895_v9 = vpop.f32.mrb[0].mxu1 }
 0x12d   :  { %v877_v10 = vpop.f32.mrb[3].mxu0  ;;  %v896_v11 = vpop.f32.mrb[1].mxu1 }
 0x12e   :  { %v527_v12 = vadd.f32 %v875_v7, %v790_v5  ;;  %v897_v13 = vadd.f32 %v896_v11, %v895_v9  ;;  %v898_v14 = vpop.f32.mrb[2].mxu1 }
 0x12f   :  { %v899_v15 = vpop.f32.mrb[3].mxu1 }
 0x130   :  { %v567_v16 = vadd.f32 %v897_v13, %v527_v12 }
 0x134   :  { %v646_v17 = vpop.f32.mrb[4].mxu1 }
 0x135   :  { %v938_v18 = vpop.f32.mrb[5].mxu1 }
 0x136   :  { %v649_v19 = vpop.f32.mrb[6].mxu1 }
 0x137   :  { %v939_v20 = vpop.f32.mrb[7].mxu1 }
 0x14a   :  { %v917_v21 = vpop.f32.mrb[4].mxu0 }
 0x14b   :  { %v918_v22 = vpop.f32.mrb[5].mxu0 }
 0x14c   :  { %v919_v23 = vadd.f32 %v918_v22, %v917_v21  ;;  %v920_v24 = vpop.f32.mrb[6].mxu0 }
 0x14d   :  { %v921_v25 = vpop.f32.mrb[7].mxu0 }
 0x14e   :  { %v607_v26 = vadd.f32 %v919_v23, %v567_v16 }
 0x150   :  { %v647_v27 = vadd.f32 %v646_v17, %v607_v26 }
 0x152   :  { %v653_v28 = vand.u32 2147483647, %v647_v27  ;;  %v652_v34 = vmin.f32 %v647_v27, 0.0 }
 0x154   :  { %v654_v29 = vsub.f32 0.0, %v653_v28 }
 0x156   :  { %v655_v30 = vmul.f32 1.442695, %v654_v29 }
 0x158   :  { %1032 = vpow2.f32 %v655_v30 }
 0x162   :  { %v1033_v31 = vpop.eup %1032 }
 0x163   :  { %v657_v32 = vadd.f32 1.0, %v1033_v31 }
 0x165   :  { %1034 = vlog2.f32 %v657_v32 }
 0x16f   :  { %v1035_v33 = vpop.eup %1034 }
 0x170   :  { %v659_v35 = vmul.f32 0.6931472, %v1035_v33 }
 0x172   :  { %v660_v36 = vsub.f32 %v652_v34, %v659_v35 }
 0x174   :  { %v661_v37 = vpack.c.bf16 %v660_v36, %v660_v36 }
 0x176   :  { %957 = vmatmul.mubr.bf16.vlgmr.msra.gmra.mrb[8].mxu1 %v661_v37 }
 0x249   :  { %v767_v39 = vpop.f32.mrb[8].mxu1 }
 0x24a   :  { %v768_v40 = vadd.f32 %v848_v38, %v767_v39  ;;  %v958_v41 = vpop.f32.mrb[9].mxu1 }
 0x24b   :  { %v770_v42 = vpop.f32.mrb[10].mxu1 }
 0x24c   :  { %773 = vst [vmem:[#allocation8] sm:$0xff] %v768_v40  ;;  %v959_v43 = vpop.f32.mrb[11].mxu1 }
 0x24d   :  { %1113 = shalt.err (!%p1110_p0)
}
 0x24e   :  { %s1114_s4 = scalar_lea.hbm %s1235_s5, 128 }
 0x24f   :  { %p1115_p1 = scmp.ne.s32.totalorder %s1235_s5, %s1114_s4  ;;  %p1118_p2 = scmp.lt.u32.totalorder %s1114_s4, %s1235_s5 }
 0x251   :  { %p1120_p3 = pnand %p1118_p2, %p1115_p1 }
 0x253   :  { %1123 = shalt.err (!%p1120_p3)
}
 0x254   :  { %783 = dma.vmem_to_hbm [thread:$0]  %s781_s7, 128, %s1235_s5, [#allocation4]  }
 0x255   :  { %1128 = dma.done.wait [#allocation4], 128  }
 0x256   :  { %1129 = vsyncadd [#allocation4], 4294967168 }
 0x257   :  { %787 = vsyncpa [#allocation3], 1 }
 0x258   :  { %788 = vsyncpa [#allocation6], 1 }
 0x259   :  { %789 = vsyncpa [#allocation4], 1 }

</bundles_post_ra>
